<compile_context>
chip_gen: v5e
topology: v5e:2x2
jax: 0.10.0
libtpu: 0.0.40
codegen_flags: <defaults>
</compile_context>

<pallas_src>
import functools

import jax
import jax.numpy as jnp
from jax.experimental import pallas as pl
from jax.experimental.pallas import tpu as pltpu


_TARGET_BLOCK_ELEMS = 256 * 1024          # per plane per block (1 MiB at f32)
_VMEM_LIMIT_BYTES = 40 * 1024 * 1024


def _plane_2d(n_plane, natural_last):
    """Factor a contiguous plane of n_plane elements into a lane-dense (R, L)."""
    # Prefer the widest multiple-of-128 lane width that divides the plane.
    for lane in range(2048, 127, -128):
        if n_plane % lane == 0:
            return n_plane // lane, lane
    # Rare awkward shapes: fall back to a multiple-of-8 lane width, then to the
    # natural minor dim (masked partial-lane stores, but still correct).
    for lane in range(1024, 7, -8):
        if n_plane % lane == 0:
            return n_plane // lane, lane
    return n_plane // natural_last, natural_last


def _row_tile(n_rows, lane):
    """Row-tile: ~_TARGET_BLOCK_ELEMS/plane, multiple of 8, dividing n_rows."""
    t = max(8, (_TARGET_BLOCK_ELEMS // lane // 8) * 8)
    if n_rows <= t:
        # Small plane: split in two equal multiple-of-8 halves when possible so
        # the "parallel" grid has >=2 steps for the two v7x TensorCores.
        if n_rows % 16 == 0 and n_rows >= 32:
            return n_rows // 2
        return n_rows
    # Prefer an exact multiple-of-8 divisor of n_rows near the target size so
    # there is no padded/masked tail block.
    for cand in range(t, max(8, t // 2) - 1, -8):
        if n_rows % cand == 0:
            return cand
    # Fall back: target-sized tiles with one partial (masked) tail block.
    return min(t, n_rows)


def _block_index_map(n_lead):
    def index_map(i):
        return (0,) * n_lead + (i, 0)
    return index_map


def _dwt_kernel(x_ref, o_ref):
    # x_ref: (2, 2, tr, L) raw parity planes indexed [row_parity, col_parity].
    f32 = jnp.float32
    x1 = x_ref[0, 0].astype(f32)          # even row, even col
    x2 = x_ref[1, 0].astype(f32)          # odd  row, even col
    x3 = x_ref[0, 1].astype(f32)          # even row, odd  col
    x4 = x_ref[1, 1].astype(f32)          # odd  row, odd  col
    p = (x1 + x2) * 0.5
    q = (x3 + x4) * 0.5
    r = (x2 - x1) * 0.5
    s = (x4 - x3) * 0.5
    dt = o_ref.dtype
    o_ref[0] = (p + q).astype(dt)         # LL
    o_ref[1] = (q - p).astype(dt)         # HL
    o_ref[2] = (r + s).astype(dt)         # LH
    o_ref[3] = (s - r).astype(dt)         # HH


def _iwt_kernel(x_ref, o_ref):
    # x_ref: (4, tr, L) subbands [LL, HL, LH, HH]; o_ref: (2, 2, tr, L) planes.
    f32 = jnp.float32
    x1 = x_ref[0].astype(f32)
    x2 = x_ref[1].astype(f32)
    x3 = x_ref[2].astype(f32)
    x4 = x_ref[3].astype(f32)
    sa = (x1 + x4) * 0.5
    sb = (x2 + x3) * 0.5
    da = (x1 - x4) * 0.5
    db = (x2 - x3) * 0.5
    dt = o_ref.dtype
    o_ref[0, 0] = (sa - sb).astype(dt)    # -> out[:, :, 0::2, 0::2]
    o_ref[1, 0] = (da - db).astype(dt)    # -> out[:, :, 1::2, 0::2]
    o_ref[0, 1] = (da + db).astype(dt)    # -> out[:, :, 0::2, 1::2]
    o_ref[1, 1] = (sa + sb).astype(dt)    # -> out[:, :, 1::2, 1::2]


def _butterfly_call(kernel, planes, out_lead, out_dtype):
    """Run a stacked 4-plane Haar butterfly on (*lead, R, L) planes."""
    in_lead = planes.shape[:-2]
    R, L = planes.shape[-2:]
    tr = _row_tile(R, L)
    n_plane = R * L
    in_bytes = jnp.dtype(planes.dtype).itemsize
    out_bytes = jnp.dtype(out_dtype).itemsize
    return pl.pallas_call(
        kernel,
        grid=(pl.cdiv(R, tr),),
        in_specs=[pl.BlockSpec((*in_lead, tr, L), _block_index_map(len(in_lead)))],
        out_specs=pl.BlockSpec((*out_lead, tr, L), _block_index_map(len(out_lead))),
        out_shape=jax.ShapeDtypeStruct((*out_lead, R, L), out_dtype),
        compiler_params=pltpu.CompilerParams(
            dimension_semantics=("parallel",),
            vmem_limit_bytes=_VMEM_LIMIT_BYTES,
        ),
        cost_estimate=pl.CostEstimate(
            flops=12 * n_plane,
            transcendentals=0,
            bytes_accessed=4 * n_plane * (in_bytes + out_bytes),
        ),
    )(planes)


@functools.partial(jax.jit, static_argnames=("inverse",))
def wavelet_transform(x, inverse=False):
    """Forward pass of WaveletTransform (NCHW). Native-dtype I/O, f32 math."""
    if not inverse:
        # ---- DWT: (B, C, H, W) -> (4B, C, H/2, W/2), output keeps x.dtype ----
        B, C, H, W = x.shape
        assert H % 2 == 0 and W % 2 == 0, "DWT requires even spatial dims"
        Hh, Wh = H // 2, W // 2
        n_plane = B * C * Hh * Wh
        R, L = _plane_2d(n_plane, Wh)
        # Single fused layout pass: gather the 4 (row-parity, col-parity) planes.
        planes = (x.reshape(B, C, Hh, 2, Wh, 2)
                   .transpose(3, 5, 0, 1, 2, 4)     # (2, 2, B, C, Hh, Wh)
                   .reshape(2, 2, R, L))
        sub = _butterfly_call(_dwt_kernel, planes, out_lead=(4,),
                              out_dtype=x.dtype)    # (4, R, L)
        # Free contiguous reshape == concatenation of LL/HL/LH/HH along batch.
        return sub.reshape(4 * B, C, Hh, Wh)
    else:
        # ---- IWT: (4B, C, h, w) -> (B, C, 2h, 2w), float32 (as in torch) ----
        B4, C, h, w = x.shape
        assert B4 % 4 == 0, "IWT input batch must be a multiple of 4"
        B = B4 // 4
        n_plane = B * C * h * w
        R, L = _plane_2d(n_plane, w)
        sub = x.reshape(4, R, L)                    # free: contiguous split
        planes = _butterfly_call(_iwt_kernel, sub, out_lead=(2, 2),
                                 out_dtype=jnp.float32)   # (2, 2, R, L)
        # Single fused layout pass: scatter parity planes into (B, C, 2h, 2w).
        return (planes.reshape(2, 2, B, C, h, w)
                      .transpose(2, 3, 4, 0, 5, 1)  # (B, C, h, 2, w, 2)
                      .reshape(B, C, 2 * h, 2 * w))


# ---------------- pure-JAX references for correctness checks ----------------

def _dwt_ref(x):
    x01 = x[:, :, 0::2, :] / 2
    x02 = x[:, :, 1::2, :] / 2
    x1 = x01[:, :, :, 0::2]
    x2 = x02[:, :, :, 0::2]
    x3 = x01[:, :, :, 1::2]
    x4 = x02[:, :, :, 1::2]
    return jnp.concatenate((x1 + x2 + x3 + x4,
                            -x1 - x2 + x3 + x4,
                            -x1 + x2 - x3 + x4,
                            x1 - x2 - x3 + x4), axis=0)


def _iwt_ref(x):
    B = x.shape[0] // 4
    x1 = x[0 * B:1 * B] / 2
    x2 = x[1 * B:2 * B] / 2
    x3 = x[2 * B:3 * B] / 2
    x4 = x[3 * B:4 * B] / 2
    Bo, C, hh, ww = x1.shape
    h = jnp.zeros((Bo, C, 2 * hh, 2 * ww), jnp.float32)
    h = h.at[:, :, 0::2, 0::2].set(x1 - x2 - x3 + x4)
    h = h.at[:, :, 1::2, 0::2].set(x1 - x2 + x3 - x4)
    h = h.at[:, :, 0::2, 1::2].set(x1 + x2 - x3 - x4)
    h = h.at[:, :, 1::2, 1::2].set(x1 + x2 + x3 + x4)
    return h


if __name__ == "__main__":
    # Small shape consistent with the module (batch=2, channels=4, spatial=16).
    key = jax.random.PRNGKey(0)
    x = jax.random.normal(key, (2, 4, 16, 16), dtype=jnp.float32)

    y = jax.block_until_ready(wavelet_transform(x, inverse=False))
    assert y.shape == (8, 4, 8, 8)
    assert y.dtype == jnp.float32
    assert jnp.allclose(y, _dwt_ref(x), atol=1e-6)

    xr = jax.block_until_ready(wavelet_transform(y, inverse=True))
    assert xr.shape == (2, 4, 16, 16)
    assert jnp.allclose(xr, _iwt_ref(y), atol=1e-6)
    assert jnp.allclose(xr, x, atol=1e-5)           # exact Haar round trip

    # Native bf16 I/O path (f32 math in-kernel, bf16 HBM traffic for the DWT;
    # IWT returns float32 like the torch module's `.float()` output buffer).
    xb = x.astype(jnp.bfloat16)
    yb = jax.block_until_ready(wavelet_transform(xb, inverse=False))
    assert yb.shape == (8, 4, 8, 8)
    assert yb.dtype == jnp.bfloat16
    assert jnp.allclose(yb.astype(jnp.float32), _dwt_ref(x), atol=1e-1)
    xbr = jax.block_until_ready(wavelet_transform(yb, inverse=True))
    assert xbr.dtype == jnp.float32
    assert jnp.allclose(xbr, x, atol=1e-1)

    # Larger shape: exercises the multi-step, lane-dense, exactly-tiled grid.
    x2 = jax.random.normal(jax.random.PRNGKey(1), (4, 8, 256, 256),
                           dtype=jnp.float32)
    y2 = jax.block_until_ready(wavelet_transform(x2, inverse=False))
    assert y2.shape == (16, 8, 128, 128)
    assert jnp.allclose(y2, _dwt_ref(x2), atol=1e-5)
    x2r = jax.block_until_ready(wavelet_transform(y2, inverse=True))
    assert x2r.shape == (4, 8, 256, 256)
    assert jnp.allclose(x2r, x2, atol=1e-5)

    print("KERNEL_OK")
</pallas_src>

<mosaic_0001>
module attributes {stable_mosaic.version = 11 : i64} {
  func.func @_dwt_kernel(%arg0: i32, %arg1: memref<2x2x1x512xf32, #tpu.memory_space<vmem>>, %arg2: memref<4x1x512xf32, #tpu.memory_space<vmem>>) attributes {dimension_semantics = [#tpu.dimension_semantics<parallel>], iteration_bounds = array<i64: 1>, scalar_prefetch = 0 : i64, scratch_operands = 0 : i64, tpu.core_type = #tpu.core_type<tc>, window_params = [{transform_indices = @transform_0, window_bounds = array<i64: 2, 2, 1, 512>}, {transform_indices = @transform_1, window_bounds = array<i64: 4, 1, 512>}]} {
    %c0 = arith.constant 0 : index
    %c0_0 = arith.constant 0 : index
    %c0_1 = arith.constant 0 : index
    %c0_2 = arith.constant 0 : index
    %0 = vector.load %arg1[%c0, %c0_0, %c0_1, %c0_2] : memref<2x2x1x512xf32, #tpu.memory_space<vmem>>, vector<1x1x1x512xf32>
    %1 = vector.shape_cast %0 : vector<1x1x1x512xf32> to vector<1x512xf32>
    %c1 = arith.constant 1 : index
    %c0_3 = arith.constant 0 : index
    %c0_4 = arith.constant 0 : index
    %c0_5 = arith.constant 0 : index
    %2 = vector.load %arg1[%c1, %c0_3, %c0_4, %c0_5] : memref<2x2x1x512xf32, #tpu.memory_space<vmem>>, vector<1x1x1x512xf32>
    %3 = vector.shape_cast %2 : vector<1x1x1x512xf32> to vector<1x512xf32>
    %c0_6 = arith.constant 0 : index
    %c1_7 = arith.constant 1 : index
    %c0_8 = arith.constant 0 : index
    %c0_9 = arith.constant 0 : index
    %4 = vector.load %arg1[%c0_6, %c1_7, %c0_8, %c0_9] : memref<2x2x1x512xf32, #tpu.memory_space<vmem>>, vector<1x1x1x512xf32>
    %5 = vector.shape_cast %4 : vector<1x1x1x512xf32> to vector<1x512xf32>
    %c1_10 = arith.constant 1 : index
    %c1_11 = arith.constant 1 : index
    %c0_12 = arith.constant 0 : index
    %c0_13 = arith.constant 0 : index
    %6 = vector.load %arg1[%c1_10, %c1_11, %c0_12, %c0_13] : memref<2x2x1x512xf32, #tpu.memory_space<vmem>>, vector<1x1x1x512xf32>
    %7 = vector.shape_cast %6 : vector<1x1x1x512xf32> to vector<1x512xf32>
    %8 = arith.addf %1, %3 : vector<1x512xf32>
    %cst = arith.constant 5.000000e-01 : f32
    %9 = vector.broadcast %cst : f32 to vector<1x512xf32>
    %10 = arith.mulf %8, %9 : vector<1x512xf32>
    %11 = arith.addf %5, %7 : vector<1x512xf32>
    %cst_14 = arith.constant 5.000000e-01 : f32
    %12 = vector.broadcast %cst_14 : f32 to vector<1x512xf32>
    %13 = arith.mulf %11, %12 : vector<1x512xf32>
    %14 = arith.subf %3, %1 : vector<1x512xf32>
    %cst_15 = arith.constant 5.000000e-01 : f32
    %15 = vector.broadcast %cst_15 : f32 to vector<1x512xf32>
    %16 = arith.mulf %14, %15 : vector<1x512xf32>
    %17 = arith.subf %7, %5 : vector<1x512xf32>
    %cst_16 = arith.constant 5.000000e-01 : f32
    %18 = vector.broadcast %cst_16 : f32 to vector<1x512xf32>
    %19 = arith.mulf %17, %18 : vector<1x512xf32>
    %20 = arith.addf %10, %13 : vector<1x512xf32>
    %c0_17 = arith.constant 0 : index
    %c0_18 = arith.constant 0 : index
    %c0_19 = arith.constant 0 : index
    %21 = vector.load %arg2[%c0_17, %c0_18, %c0_19] : memref<4x1x512xf32, #tpu.memory_space<vmem>>, vector<1x1x512xf32>
    %22 = vector.shape_cast %21 : vector<1x1x512xf32> to vector<1x512xf32>
    %23 = vector.shape_cast %20 : vector<1x512xf32> to vector<1x1x512xf32>
    tpu.vector_store %arg2[%c0_17, %c0_18, %c0_19], %23 {strides = array<i32>} : memref<4x1x512xf32, #tpu.memory_space<vmem>>, vector<1x1x512xf32>,
    %24 = arith.subf %13, %10 : vector<1x512xf32>
    %c1_20 = arith.constant 1 : index
    %c0_21 = arith.constant 0 : index
    %c0_22 = arith.constant 0 : index
    %25 = vector.load %arg2[%c1_20, %c0_21, %c0_22] : memref<4x1x512xf32, #tpu.memory_space<vmem>>, vector<1x1x512xf32>
    %26 = vector.shape_cast %25 : vector<1x1x512xf32> to vector<1x512xf32>
    %27 = vector.shape_cast %24 : vector<1x512xf32> to vector<1x1x512xf32>
    tpu.vector_store %arg2[%c1_20, %c0_21, %c0_22], %27 {strides = array<i32>} : memref<4x1x512xf32, #tpu.memory_space<vmem>>, vector<1x1x512xf32>,
    %28 = arith.addf %16, %19 : vector<1x512xf32>
    %c2 = arith.constant 2 : index
    %c0_23 = arith.constant 0 : index
    %c0_24 = arith.constant 0 : index
    %29 = vector.load %arg2[%c2, %c0_23, %c0_24] : memref<4x1x512xf32, #tpu.memory_space<vmem>>, vector<1x1x512xf32>
    %30 = vector.shape_cast %29 : vector<1x1x512xf32> to vector<1x512xf32>
    %31 = vector.shape_cast %28 : vector<1x512xf32> to vector<1x1x512xf32>
    tpu.vector_store %arg2[%c2, %c0_23, %c0_24], %31 {strides = array<i32>} : memref<4x1x512xf32, #tpu.memory_space<vmem>>, vector<1x1x512xf32>,
    %32 = arith.subf %19, %16 : vector<1x512xf32>
    %c3 = arith.constant 3 : index
    %c0_25 = arith.constant 0 : index
    %c0_26 = arith.constant 0 : index
    %33 = vector.load %arg2[%c3, %c0_25, %c0_26] : memref<4x1x512xf32, #tpu.memory_space<vmem>>, vector<1x1x512xf32>
    %34 = vector.shape_cast %33 : vector<1x1x512xf32> to vector<1x512xf32>
    %35 = vector.shape_cast %32 : vector<1x512xf32> to vector<1x1x512xf32>
    tpu.vector_store %arg2[%c3, %c0_25, %c0_26], %35 {strides = array<i32>} : memref<4x1x512xf32, #tpu.memory_space<vmem>>, vector<1x1x512xf32>,
    return
  }
  func.func @transform_0(%arg0: i32) -> (i32, i32, i32, i32) {
    %c0_i32 = arith.constant 0 : i32
    %c0_i32_0 = arith.constant 0 : i32
    %c0_i32_1 = arith.constant 0 : i32
    %c0_i32_2 = arith.constant 0 : i32
    return %c0_i32, %c0_i32_0, %arg0, %c0_i32_1 : i32, i32, i32, i32
  }
  func.func @transform_1(%arg0: i32) -> (i32, i32, i32) {
    %c0_i32 = arith.constant 0 : i32
    %c0_i32_0 = arith.constant 0 : i32
    %c0_i32_1 = arith.constant 0 : i32
    return %c0_i32, %arg0, %c0_i32_0 : i32, i32, i32
  }
}

</mosaic_0001>

<bundles_post_ra>
// kernel: wavelet_transform.1
= control target key start
LH: loop header
LB: loop body
LE: loop exit
PB: predicated region body
PF: predicated region fallthrough
CT: control target
= control target key end

     0   :  { %v24_v5 = vlaneseq  ;;  %s82_s0 = inlined_call_operand.vmem [shape: f32[2,2,1,512], index: 0, kind: input, shape index: {}]   ;;  %s83_s1 = inlined_call_operand.vmem [shape: f32[4,1,512], index: 1, kind: output, shape index: {}]  }
   0x1   :  { %v8_v0 = vld [vmem:[%s82_s0] sm:$0xf]  ;;  %v42_v1 = vld [vmem:[%s82_s0 + $0x8] sm:$0xf]  ;;  %v43_v2 = vld [vmem:[%s82_s0 + $0x4] sm:$0xf] }
   0x2   :  { %v44_v3 = vld [vmem:[%s82_s0 + $0xc] sm:$0xf]  ;;  %v15_v4 = vadd.f32 %v42_v1, %v8_v0  ;;  %v19_v6 = vsub.f32 %v42_v1, %v8_v0  ;;  %vm26_vm0 = vcmp.lt.s32.totalorder %v24_v5, 512 }
   0x3   :  { %v17_v7 = vadd.f32 %v44_v3, %v43_v2  ;;  %v21_v8 = vsub.f32 %v44_v3, %v43_v2 }
   0x4   :  { %v16_v9 = vmul.f32 0.5, %v15_v4  ;;  %v20_v10 = vmul.f32 0.5, %v19_v6 }
   0x5   :  { %v18_v11 = vmul.f32 0.5, %v17_v7  ;;  %v22_v12 = vmul.f32 0.5, %v21_v8 }
   0x7   :  { %v23_v13 = vadd.f32 %v18_v11, %v16_v9  ;;  %v29_v14 = vsub.f32 %v18_v11, %v16_v9  ;;  %v32_v15 = vadd.f32 %v22_v12, %v20_v10  ;;  %v35_v16 = vsub.f32 %v22_v12, %v20_v10 }
   0x9   :  { %28 = vst.msk [vmem:[%s83_s1] sm:$0xf] %vm26_vm0, %v23_v13 }
   0xa   :  { %45 = vst.msk [vmem:[%s83_s1 + $0x4] sm:$0xf] %vm26_vm0, %v29_v14 }
   0xb   :  { %46 = vst.msk [vmem:[%s83_s1 + $0x8] sm:$0xf] %vm26_vm0, %v32_v15 }
   0xc   :  { %47 = vst.msk [vmem:[%s83_s1 + $0xc] sm:$0xf] %vm26_vm0, %v35_v16 }

</bundles_post_ra>
